<compile_context>
chip_gen: v7x
topology: tpu7x:2x2x1
jax: 0.10.0
libtpu: 0.0.40
codegen_flags: <defaults>
</compile_context>

<pallas_src>
import jax
import jax.numpy as jnp
from jax import lax
from jax.experimental import pallas as pl
from jax.experimental.pallas import tpu as pltpu


def _static_filter_kernel(x_ref, wcombt_ref, bcomb_ref, out_ref):
    # x_ref      : (Bb, T)     input attention rows (unpadded)
    # wcombt_ref : (K, D)      combined filter, transposed: (w_fc @ w_conv).T
    # bcomb_ref  : (1, D)      combined bias:                b_conv @ w_fc.T
    # out_ref    : (Bb, T, D)  output already in the final (B, T, D) layout
    Bb, T = x_ref.shape
    K, D = wcombt_ref.shape
    pad = (K - 1) // 2

    x = x_ref[...]                                             # (Bb, T)
    if pad > 0:
        zeros = jnp.zeros((Bb, pad), dtype=x.dtype)
        x_pad = jnp.concatenate([zeros, x, zeros], axis=1)     # (Bb, T + K - 1)
    else:
        x_pad = x

    w = wcombt_ref[...]                                        # (K, D)
    bias = bcomb_ref[...]                                      # (1, D)

    # Bb is small (<= 16 by construction) so this unrolls at trace time;
    # each row is a single (T,K)x(K,D) contraction + bias (folded conv+fc).
    for b in range(Bb):
        row = x_pad[b:b + 1, :]                                # (1, Tp)
        # shifted[k, t] = x_pad[b, t + k]  (cross-correlation, as torch Conv1d)
        shifted = jnp.concatenate(
            [row[:, k:k + T] for k in range(K)], axis=0)       # (K, T)
        # out[t, d] = sum_k shifted[k, t] * w[k, d]   ("TN" dot)
        out_td = lax.dot_general(
            shifted, w,
            dimension_numbers=(((0,), (0,)), ((), ())),
            preferred_element_type=jnp.float32)                # (T, D)
        out_ref[b, :, :] = (out_td + bias).astype(out_ref.dtype)


def _pick_block_b(B: int) -> int:
    """Rows per grid step: whole batch if small, else a sublane-aligned
    divisor of B.  Falls back to the whole batch (grid=(1,))."""
    if B <= 16:
        return B
    for bb in (16, 8):
        if B % bb == 0:
            return bb
    return B


@jax.jit
def static_filter(prev_attn, w_conv, b_conv, w_fc):
    """prev_attn: (B, T); w_conv: (C, K); b_conv: (1, C); w_fc: (D, C).
    Returns (B, T, D), matching StaticFilter.forward."""
    B, T = prev_attn.shape
    C, K = w_conv.shape
    D = w_fc.shape[0]
    assert K % 2 == 1, "kernel size of StaticFilter must be odd"

    # Fold conv + linear once (tiny GEMMs, done outside the kernel):
    #   out[b,t,d] = sum_k W_comb[d,k] * x_pad[b,t+k] + b_comb[d]
    w_comb_t = jnp.dot(w_fc, w_conv).T        # (K, D)
    b_comb = jnp.dot(b_conv, w_fc.T)          # (1, D)

    Bb = _pick_block_b(B)

    return pl.pallas_call(
        _static_filter_kernel,
        out_shape=jax.ShapeDtypeStruct((B, T, D), prev_attn.dtype),
        grid_spec=pltpu.PrefetchScalarGridSpec(
            num_scalar_prefetch=0,
            grid=(B // Bb,),
            in_specs=[
                pl.BlockSpec((Bb, T), lambda i: (i, 0)),
                pl.BlockSpec((K, D), lambda i: (0, 0)),
                pl.BlockSpec((1, D), lambda i: (0, 0)),
            ],
            out_specs=pl.BlockSpec((Bb, T, D), lambda i: (i, 0, 0)),
        ),
        compiler_params=pltpu.CompilerParams(
            dimension_semantics=("parallel",),
        ),
    )(prev_attn, w_comb_t, b_comb)


def _reference(prev_attn, w_conv, b_conv, w_fc):
    """Pure-JAX reference matching the PyTorch module semantics (unfused)."""
    B, T = prev_attn.shape
    C, K = w_conv.shape
    pad = (K - 1) // 2
    x_pad = jnp.pad(prev_attn, ((0, 0), (pad, pad)))
    shifted = jnp.stack([x_pad[:, k:k + T] for k in range(K)], axis=-1)  # (B,T,K)
    conv = jnp.einsum("btk,ck->btc", shifted, w_conv) + b_conv[0]         # (B,T,C)
    return jnp.einsum("btc,dc->btd", conv, w_fc)                          # (B,T,D)


if __name__ == "__main__":
    # StaticFilter(channels=4, kernel_size=5, out_dim=8), seq len T=16, batch B=2
    B, T = 2, 16
    channels, kernel_size, out_dim = 4, 5, 8

    key = jax.random.PRNGKey(0)
    k_x, k_wc, k_bc, k_fc = jax.random.split(key, 4)

    prev_attn = jax.random.normal(k_x, (B, T), dtype=jnp.float32)
    # conv weight is (C, 1, K) in torch; in_channels=1 is squeezed -> (C, K)
    w_conv = 0.1 * jax.random.normal(k_wc, (channels, kernel_size), dtype=jnp.float32)
    b_conv = 0.1 * jax.random.normal(k_bc, (1, channels), dtype=jnp.float32)
    w_fc = 0.1 * jax.random.normal(k_fc, (out_dim, channels), dtype=jnp.float32)

    out = static_filter(prev_attn, w_conv, b_conv, w_fc)
    out = jax.block_until_ready(out)

    ref = _reference(prev_attn, w_conv, b_conv, w_fc)
    assert out.shape == (B, T, out_dim), out.shape
    assert jnp.allclose(out, ref, atol=1e-5, rtol=1e-4), "mismatch vs reference"

    print("KERNEL_OK")
</pallas_src>

<mosaic_0001>
module attributes {stable_mosaic.version = 11 : i64} {
  func.func @_static_filter_kernel(%arg0: i32, %arg1: memref<2x16xf32, #tpu.memory_space<vmem>>, %arg2: memref<5x8xf32, #tpu.memory_space<vmem>>, %arg3: memref<1x8xf32, #tpu.memory_space<vmem>>, %arg4: memref<2x16x8xf32, #tpu.memory_space<vmem>>) attributes {dimension_semantics = [#tpu.dimension_semantics<parallel>], iteration_bounds = array<i64: 1>, scalar_prefetch = 0 : i64, scratch_operands = 0 : i64, tpu.core_type = #tpu.core_type<tc>, window_params = [{transform_indices = @transform_0, window_bounds = array<i64: 2, 16>}, {pipeline_mode = #tpu.pipeline_mode<synchronous>, transform_indices = @transform_1, window_bounds = array<i64: 5, 8>}, {pipeline_mode = #tpu.pipeline_mode<synchronous>, transform_indices = @transform_2, window_bounds = array<i64: 1, 8>}, {transform_indices = @transform_3, window_bounds = array<i64: 2, 16, 8>}]} {
    %c0 = arith.constant 0 : index
    %c0_0 = arith.constant 0 : index
    %0 = vector.load %arg1[%c0, %c0_0] : memref<2x16xf32, #tpu.memory_space<vmem>>, vector<2x16xf32>
    %cst = arith.constant 0.000000e+00 : f32
    %1 = vector.broadcast %cst : f32 to vector<2x2xf32>
    %2 = tpu.concatenate %1, %0, %1 in 1 : vector<2x2xf32>, vector<2x16xf32>, vector<2x2xf32> -> vector<2x20xf32>
    %c0_1 = arith.constant 0 : index
    %c0_2 = arith.constant 0 : index
    %3 = vector.load %arg2[%c0_1, %c0_2] : memref<5x8xf32, #tpu.memory_space<vmem>>, vector<5x8xf32>
    %c0_3 = arith.constant 0 : index
    %c0_4 = arith.constant 0 : index
    %4 = vector.load %arg3[%c0_3, %c0_4] : memref<1x8xf32, #tpu.memory_space<vmem>>, vector<1x8xf32>
    %5 = vector.extract_strided_slice %2 {offsets = [0, 0], sizes = [1, 20], strides = [1, 1]} : vector<2x20xf32> to vector<1x20xf32>
    %6 = vector.extract_strided_slice %5 {offsets = [0, 0], sizes = [1, 16], strides = [1, 1]} : vector<1x20xf32> to vector<1x16xf32>
    %7 = vector.extract_strided_slice %5 {offsets = [0, 1], sizes = [1, 16], strides = [1, 1]} : vector<1x20xf32> to vector<1x16xf32>
    %8 = vector.extract_strided_slice %5 {offsets = [0, 2], sizes = [1, 16], strides = [1, 1]} : vector<1x20xf32> to vector<1x16xf32>
    %9 = vector.extract_strided_slice %5 {offsets = [0, 3], sizes = [1, 16], strides = [1, 1]} : vector<1x20xf32> to vector<1x16xf32>
    %10 = vector.extract_strided_slice %5 {offsets = [0, 4], sizes = [1, 16], strides = [1, 1]} : vector<1x20xf32> to vector<1x16xf32>
    %11 = tpu.concatenate %6, %7, %8, %9, %10 in 0 : vector<1x16xf32>, vector<1x16xf32>, vector<1x16xf32>, vector<1x16xf32>, vector<1x16xf32> -> vector<5x16xf32>
    %cst_5 = arith.constant dense<0.000000e+00> : vector<16x8xf32>
    %12 = tpu.matmul %11, %3, %cst_5 {dimension_numbers = #tpu.dot_dimension_numbers<[0], [0], [1], [1], [0, 1, 1, 1], [], []>} : vector<5x16xf32>, vector<5x8xf32>, vector<16x8xf32> -> vector<16x8xf32>
    %13 = vector.broadcast %4 : vector<1x8xf32> to vector<16x8xf32>
    %14 = arith.addf %12, %13 : vector<16x8xf32>
    %c0_6 = arith.constant 0 : index
    %c0_7 = arith.constant 0 : index
    %c0_8 = arith.constant 0 : index
    %15 = vector.load %arg4[%c0_6, %c0_7, %c0_8] : memref<2x16x8xf32, #tpu.memory_space<vmem>>, vector<1x16x8xf32>
    %16 = vector.shape_cast %15 : vector<1x16x8xf32> to vector<16x8xf32>
    %17 = vector.shape_cast %14 : vector<16x8xf32> to vector<1x16x8xf32>
    tpu.vector_store %arg4[%c0_6, %c0_7, %c0_8], %17 {strides = array<i32>} : memref<2x16x8xf32, #tpu.memory_space<vmem>>, vector<1x16x8xf32>,
    %18 = vector.extract_strided_slice %2 {offsets = [1, 0], sizes = [1, 20], strides = [1, 1]} : vector<2x20xf32> to vector<1x20xf32>
    %19 = vector.extract_strided_slice %18 {offsets = [0, 0], sizes = [1, 16], strides = [1, 1]} : vector<1x20xf32> to vector<1x16xf32>
    %20 = vector.extract_strided_slice %18 {offsets = [0, 1], sizes = [1, 16], strides = [1, 1]} : vector<1x20xf32> to vector<1x16xf32>
    %21 = vector.extract_strided_slice %18 {offsets = [0, 2], sizes = [1, 16], strides = [1, 1]} : vector<1x20xf32> to vector<1x16xf32>
    %22 = vector.extract_strided_slice %18 {offsets = [0, 3], sizes = [1, 16], strides = [1, 1]} : vector<1x20xf32> to vector<1x16xf32>
    %23 = vector.extract_strided_slice %18 {offsets = [0, 4], sizes = [1, 16], strides = [1, 1]} : vector<1x20xf32> to vector<1x16xf32>
    %24 = tpu.concatenate %19, %20, %21, %22, %23 in 0 : vector<1x16xf32>, vector<1x16xf32>, vector<1x16xf32>, vector<1x16xf32>, vector<1x16xf32> -> vector<5x16xf32>
    %cst_9 = arith.constant dense<0.000000e+00> : vector<16x8xf32>
    %25 = tpu.matmul %24, %3, %cst_9 {dimension_numbers = #tpu.dot_dimension_numbers<[0], [0], [1], [1], [0, 1, 1, 1], [], []>} : vector<5x16xf32>, vector<5x8xf32>, vector<16x8xf32> -> vector<16x8xf32>
    %26 = vector.broadcast %4 : vector<1x8xf32> to vector<16x8xf32>
    %27 = arith.addf %25, %26 : vector<16x8xf32>
    %c1 = arith.constant 1 : index
    %c0_10 = arith.constant 0 : index
    %c0_11 = arith.constant 0 : index
    %28 = vector.load %arg4[%c1, %c0_10, %c0_11] : memref<2x16x8xf32, #tpu.memory_space<vmem>>, vector<1x16x8xf32>
    %29 = vector.shape_cast %28 : vector<1x16x8xf32> to vector<16x8xf32>
    %30 = vector.shape_cast %27 : vector<16x8xf32> to vector<1x16x8xf32>
    tpu.vector_store %arg4[%c1, %c0_10, %c0_11], %30 {strides = array<i32>} : memref<2x16x8xf32, #tpu.memory_space<vmem>>, vector<1x16x8xf32>,
    return
  }
  func.func @transform_0(%arg0: i32) -> (i32, i32) {
    %c0_i32 = arith.constant 0 : i32
    %c0_i32_0 = arith.constant 0 : i32
    return %arg0, %c0_i32 : i32, i32
  }
  func.func @transform_1(%arg0: i32) -> (i32, i32) {
    %c0_i32 = arith.constant 0 : i32
    %c0_i32_0 = arith.constant 0 : i32
    %c0_i32_1 = arith.constant 0 : i32
    return %c0_i32, %c0_i32_0 : i32, i32
  }
  func.func @transform_2(%arg0: i32) -> (i32, i32) {
    %c0_i32 = arith.constant 0 : i32
    %c0_i32_0 = arith.constant 0 : i32
    %c0_i32_1 = arith.constant 0 : i32
    return %c0_i32, %c0_i32_0 : i32, i32
  }
  func.func @transform_3(%arg0: i32) -> (i32, i32, i32) {
    %c0_i32 = arith.constant 0 : i32
    %c0_i32_0 = arith.constant 0 : i32
    %c0_i32_1 = arith.constant 0 : i32
    return %arg0, %c0_i32, %c0_i32_0 : i32, i32, i32
  }
}

</mosaic_0001>

<bundles_post_ra>
// kernel: static_filter.1
= control target key start
LH: loop header
LB: loop body
LE: loop exit
PB: predicated region body
PF: predicated region fallthrough
CT: control target
= control target key end

     0   :  { %s346_s14 = smov 2   ;;  %vm19_vm0 = vcmask 15360   ;;  %vm21_vm1 = vcmask 146432   ;;  %s347_s15 = smov 127   ;;  %vm42_vm2 = vcmask 1040384   ;;  %vm44_vm3 = vcmask 1041408   ;;  %s392_s0 = inlined_call_operand.vmem [shape: f32[2,16], index: 0, kind: input, shape index: {}]   ;;  %s393_s1 = inlined_call_operand.vmem [shape: f32[5,8], index: 1, kind: input, shape index: {}]   ;;  %s394_s2 = inlined_call_operand.vmem [shape: f32[1,8], index: 2, kind: input, shape index: {}]   ;;  %s395_s3 = inlined_call_operand.vmem [shape: f32[2,16,8], index: 3, kind: output, shape index: {}]  }
   0x1   :  { %v14_v0 = vld [vmem:[%s392_s0] sm:$0x3]  ;;  %s348_s16 = smov 126   ;;  %s349_s17 = smov 125   ;;  %vm46_vm4 = vcmask 1042432   ;;  %vm48_vm5 = vcmask 1043456  }
   0x2   :  { %16 = vrot.lane.b32.xlu0 %v14_v0, %s346_s14  ;;  %s350_s0 = smov 124   ;;  %vm95_vm6 = vcmask 1044480   ;;  %v23_v25 = vld [vmem:[%s393_s1] sm:$0x1f]  ;;  %vm88_vm7 = vcmask 39936   ;;  %vm174_vm8 = vcmask 64512  }
   0x3   :  { %330 = vmatprep.subr.msk.mxu0 %vm95_vm6, %v23_v25  ;;  %335 = vmatprep.subr.msk.mxu1 %vm95_vm6, %v23_v25  ;;  %v315_v30 = vld [vmem:[%s394_s2] ss:$0 sm:$0xff] }
   0x4   :  { %331 = vmatpush3.msk.msra.mxu0 %vm95_vm6, %v23_v25  ;;  %336 = vmatpush3.msk.msra.mxu1 %vm95_vm6, %v23_v25 }
  0x74   :  { %v17_v1 = vpop.permute.xlu0 %16 }
  0x75   :  { %v20_v2 = vsel %vm19_vm0, 0.0, %v17_v1 }
  0x76   :  { %v22_v3 = vsel %vm21_vm1, %v20_v2, 0.0 }
  0x77   :  { %179 = vrot.lane.b32.xlu1 %v22_v3, %s347_s15  ;;  %v26_v4 = vrot.slane %v22_v3, 7  ;;  %v30_v5 = vrot.slane %v22_v3, 6  ;;  %v34_v6 = vrot.slane %v22_v3, 5  ;;  %v38_v7 = vrot.slane %v22_v3, 4 }
  0x78   :  { %v177_v14 = vrot.slane %v22_v3, 1 }
  0x79   :  { %27 = vrot.lane.b32.xlu0 %v26_v4, %s347_s15 }
  0x7b   :  { %31 = vrot.lane.b32.xlu1 %v30_v5, %s348_s16 }
  0x7d   :  { %182 = vrot.lane.b32.xlu0 %v26_v4, %s348_s16 }
  0x7f   :  { %35 = vrot.lane.b32.xlu1 %v34_v6, %s349_s17 }
  0x81   :  { %185 = vrot.lane.b32.xlu0 %v30_v5, %s349_s17 }
  0x83   :  { %39 = vrot.lane.b32.xlu1 %v38_v7, %s350_s0 }
  0x85   :  { %188 = vrot.lane.b32.xlu0 %v34_v6, %s350_s0 }
  0xe9   :  { %v180_v8 = vpop.permute.xlu1 %179 }
  0xea   :  { %v191_v17 = vsel %vm42_vm2, %v177_v14, %v180_v8 }
  0xeb   :  { %v28_v9 = vpop.permute.xlu0 %27 }
  0xec   :  { %v43_v12 = vsel %vm42_vm2, %v22_v3, %v28_v9 }
  0xed   :  { %v32_v10 = vpop.permute.xlu1 %31 }
  0xee   :  { %v45_v16 = vsel %vm44_vm3, %v43_v12, %v32_v10 }
  0xef   :  { %v183_v11 = vpop.permute.xlu0 %182 }
  0xf0   :  { %v192_v20 = vsel %vm44_vm3, %v191_v17, %v183_v11 }
  0xf1   :  { %v36_v13 = vpop.permute.xlu1 %35 }
  0xf2   :  { %v47_v18 = vsel %vm46_vm4, %v45_v16, %v36_v13 }
  0xf3   :  { %v186_v15 = vpop.permute.xlu0 %185 }
  0xf4   :  { %v193_v22 = vsel %vm46_vm4, %v192_v20, %v186_v15 }
  0xf5   :  { %v40_v19 = vpop.permute.xlu1 %39 }
  0xf6   :  { %v49_v21 = vsel %vm48_vm5, %v47_v18, %v40_v19 }
  0xf7   :  { %56 = vxpose.xlu1.b32.start.end [1/1] (short) (narrow) %v49_v21, 16  ;;  %v189_v23 = vpop.permute.xlu0 %188 }
  0xf8   :  { %v194_v24 = vsel %vm48_vm5, %v193_v22, %v189_v23 }
  0xf9   :  { %195 = vxpose.xlu0.b32.start.end [1/1] (short) (narrow) %v194_v24, 16 }
 0x177   :  { %v72_v26 = vpop.trf.xlu1 }
 0x178   :  { %332 = vmatprep.mubr.msk.f32.mxu0 %vm88_vm7, %v72_v26 }
 0x179   :  { %v211_v27 = vpop.trf.xlu0 }
 0x17a   :  { %337 = vmatprep.mubr.msk.f32.mxu1 %vm88_vm7, %v211_v27 }
 0x17b   :  { %v73_v28 = vpop.trf.xlu1 }
 0x17c   :  { %333 = vmatmul.mubr.msk.f32.vlgmr.msra.gmra.mrb[0].mxu0 %vm88_vm7, %v73_v28 }
 0x17d   :  { %v212_v29 = vpop.trf.xlu0 }
 0x17e   :  { %338 = vmatmul.mubr.msk.f32.vlgmr.msra.gmra.mrb[0].mxu1 %vm88_vm7, %v212_v29 }
 0x24f   :  { %v334_v31 = vpop.f32.mrb[0].mxu0 }
 0x250   :  { %v171_v32 = vadd.f32 %v334_v31, %v315_v30  ;;  %v165_v33 = vpop.f32.mrb[1].mxu0 }
 0x251   :  { %v166_v34 = vadd.f32 %v315_v30, %v165_v33  ;;  %v339_v35 = vpop.f32.mrb[0].mxu1 }
 0x252   :  { %176 = vst.msk [vmem:[%s395_s3 + $0x8] sm:$0xff] %vm174_vm8, %v171_v32  ;;  %v305_v36 = vadd.f32 %v339_v35, %v315_v30  ;;  %v299_v37 = vpop.f32.mrb[1].mxu1 }
 0x253   :  { %175 = vst.msk [vmem:[%s395_s3] sm:$0xff] %vm174_vm8, %v166_v34  ;;  %v300_v38 = vadd.f32 %v315_v30, %v299_v37 }
 0x254   :  { %323 = vst.msk [vmem:[%s395_s3 + $0x18] sm:$0xff] %vm174_vm8, %v305_v36 }
 0x255   :  { %322 = vst.msk [vmem:[%s395_s3 + $0x10] sm:$0xff] %vm174_vm8, %v300_v38 }

</bundles_post_ra>
